<compile_context>
chip_gen: v5e
topology: v5e:2x2
jax: 0.10.0
libtpu: 0.0.40
codegen_flags: <defaults>
</compile_context>

<pallas_src>
import math

import jax
import jax.numpy as jnp
from jax.experimental import pallas as pl
from jax.experimental.pallas import tpu as pltpu


_INV_SQRT2 = 1.0 / math.sqrt(2.0)


# ----------------------------------------------------------------------------- #
# Pallas kernel: single block-diagonal matmul + bias + exact GELU
# ----------------------------------------------------------------------------- #
def _fused_kernel(p_ref, w_ref, b_ref, o_ref):
    # One dot covers all dilation branches (block-diagonal fused weight).
    acc = jnp.dot(p_ref[...], w_ref[...], preferred_element_type=jnp.float32)
    acc = acc + b_ref[...]
    # exact (erf) GELU, matching torch.nn.functional.gelu default, in f32
    out = 0.5 * acc * (1.0 + jax.lax.erf(acc * _INV_SQRT2))
    o_ref[...] = out.astype(o_ref.dtype)


def _choose_tm(M, max_tm=2048):
    """Pick the M tile.

    - If M fits in one block: full extent (always legal, any M).
    - Else: a multiple-of-8 tile <= max_tm whose step count is even and >= 4
      (the single 'parallel' grid axis is sharded over v7x's two TensorCores).
      The ragged last block, if any, is handled by Pallas: the out-of-bounds
      rows of the output store are masked, so valid rows are unaffected.
    """
    if M <= max_tm:
        return M
    steps = -(-M // max_tm)
    if steps % 2:
        steps += 1
    steps = max(steps, 4)
    tm = ((-(-M // steps) + 7) // 8) * 8
    return max(8, min(tm, max_tm))


def _fused_matmul_bias_gelu(patches, weight, bias_row, *, max_tm=2048):
    """patches: (M, nK); weight: (nK, Nout); bias_row: (1, Nout) -> (M, Nout) f32."""
    M, nK = patches.shape
    Nout = weight.shape[1]
    tm = _choose_tm(M, max_tm)
    grid = (pl.cdiv(M, tm),)

    in_specs = [
        pl.BlockSpec((tm, nK), lambda i: (i, 0)),      # fused patches (streamed)
        pl.BlockSpec((nK, Nout), lambda i: (0, 0)),    # fused weight (resident)
        pl.BlockSpec((1, Nout), lambda i: (0, 0)),     # fused bias   (resident)
    ]
    out_specs = pl.BlockSpec((tm, Nout), lambda i: (i, 0))

    cost = pl.CostEstimate(
        flops=2 * M * nK * Nout,
        transcendentals=M * Nout,
        bytes_accessed=4 * (M * nK + nK * Nout + Nout + M * Nout),
    )

    return pl.pallas_call(
        _fused_kernel,
        out_shape=jax.ShapeDtypeStruct((M, Nout), jnp.float32),
        grid=grid,
        in_specs=in_specs,
        out_specs=out_specs,
        compiler_params=pltpu.CompilerParams(dimension_semantics=("parallel",)),
        cost_estimate=cost,
    )(patches, weight, bias_row)


# ----------------------------------------------------------------------------- #
# Glue: im2col patch extraction (strided, dilated), NHWC
# ----------------------------------------------------------------------------- #
def _im2col(x_nhwc, ksize, stride, dilation, padding):
    B, H, W, C = x_nhwc.shape
    ph, pw = padding
    xp = jnp.pad(x_nhwc, ((0, 0), (ph, ph), (pw, pw), (0, 0)))
    Hp, Wp = H + 2 * ph, W + 2 * pw
    Ho = (Hp - dilation * (ksize - 1) - 1) // stride + 1
    Wo = (Wp - dilation * (ksize - 1) - 1) // stride + 1
    taps = []
    for i in range(ksize):
        for j in range(ksize):
            sl = jax.lax.slice(
                xp,
                (0, i * dilation, j * dilation, 0),
                (B, i * dilation + stride * (Ho - 1) + 1,
                 j * dilation + stride * (Wo - 1) + 1, C),
                (1, stride, stride, 1))
            taps.append(sl)                        # (B, Ho, Wo, C)
    patches = jnp.stack(taps, axis=3)              # (B, Ho, Wo, kh*kw, C)
    return patches.reshape(B, Ho, Wo, ksize * ksize * C), (Ho, Wo)


# ----------------------------------------------------------------------------- #
# PRM module (deterministic synthetic params)
# ----------------------------------------------------------------------------- #
class PRM:
    def __init__(self, img_size=224, kernel_size=4, downsample_ratio=4,
                 dilations=(1, 6, 12), in_chans=3, embed_dim=64, key=None,
                 use_bf16_operands=False):
        self.dilations = list(dilations)
        self.kernel_size = kernel_size
        self.stride = downsample_ratio
        self.downsample_ratio = downsample_ratio
        self.in_chans = in_chans
        self.embed_dim = embed_dim
        self.n_branches = len(self.dilations)
        self.out_chans = embed_dim * self.n_branches

        # deterministic Conv2d-shaped params: weight (O, C, kh, kw), bias (O,)
        if key is None:
            key = jax.random.PRNGKey(0)
        keys = jax.random.split(key, 2 * self.n_branches)
        fan_in = in_chans * kernel_size * kernel_size
        bound = 1.0 / math.sqrt(fan_in)
        self.weights, self.biases = [], []
        for n in range(self.n_branches):
            w = jax.random.uniform(keys[2 * n],
                                   (embed_dim, in_chans, kernel_size, kernel_size),
                                   minval=-bound, maxval=bound, dtype=jnp.float32)
            b = jax.random.uniform(keys[2 * n + 1], (embed_dim,),
                                   minval=-bound, maxval=bound, dtype=jnp.float32)
            self.weights.append(w)
            self.biases.append(b)

        # --- hoisted fused matmul parameters --------------------------------- #
        self.K = kernel_size * kernel_size * in_chans
        self.nK = self.K * self.n_branches
        # Block-diagonal fused weight: one (nK, out_chans) matmul == all branch
        # convs + channel concatenation.  Output is exactly out_chans wide
        # (no 128 padding): no dead-lane GELU, no extra output bytes, no slice.
        w_fused = jnp.zeros((self.nK, self.out_chans), jnp.float32)
        bias_row = jnp.zeros((1, self.out_chans), jnp.float32)
        for n in range(self.n_branches):
            # (O, C, kh, kw) -> (kh, kw, C, O) -> (K, E), matching patch order
            wm = jnp.transpose(self.weights[n], (2, 3, 1, 0)).reshape(
                self.K, embed_dim)
            w_fused = w_fused.at[n * self.K:(n + 1) * self.K,
                                 n * embed_dim:(n + 1) * embed_dim].set(wm)
            bias_row = bias_row.at[0, n * embed_dim:(n + 1) * embed_dim].set(
                self.biases[n])
        # opt-in bf16 operands (v5e MXU-bound); f32 accumulation is kept via
        # preferred_element_type.  Default f32 preserves 1e-5 parity.
        self.compute_dtype = jnp.bfloat16 if use_bf16_operands else jnp.float32
        self.w_fused = w_fused.astype(self.compute_dtype)
        self.bias_row = bias_row          # bias stays f32 (added to f32 acc)

    def __call__(self, x_nchw):
        B, C, H, W = x_nchw.shape
        x = jnp.transpose(x_nchw, (0, 2, 3, 1))          # NHWC
        extra = math.ceil(self.stride / 2) - 1
        hP = (H % self.downsample_ratio) != 0
        wP = (W % self.downsample_ratio) != 0

        cols = []
        shape_hw = None
        for d in self.dilations:
            p = math.ceil(((self.kernel_size - 1) * d + 1 - self.stride) / 2)
            ph = p + (extra if hP else 0)
            pw = p + (extra if wP else 0)
            pk, (Ho, Wo) = _im2col(x, self.kernel_size, self.stride, d, (ph, pw))
            cols.append(pk)                               # (B, Ho, Wo, K)
            if shape_hw is None:
                shape_hw = (Ho, Wo)
            else:
                assert shape_hw == (Ho, Wo)  # same spatial size for all branches
        Ho, Wo = shape_hw

        # ONE fused LHS for the single block-diagonal matmul
        patches = jnp.concatenate(cols, axis=-1).reshape(B * Ho * Wo, self.nK)
        patches = patches.astype(self.compute_dtype)

        y = _fused_matmul_bias_gelu(patches, self.w_fused, self.bias_row)
        y = y.reshape(B, Ho * Wo, self.out_chans)         # (B, Ho*Wo, N*embed_dim)
        return y, (Ho, Wo)


# ----------------------------------------------------------------------------- #
# Pure-JAX reference (for verification only)
# ----------------------------------------------------------------------------- #
def _reference(prm, x_nchw):
    B, C, H, W = x_nchw.shape
    extra = math.ceil(prm.stride / 2) - 1
    hP = (H % prm.downsample_ratio) != 0
    wP = (W % prm.downsample_ratio) != 0
    outs = []
    for n, d in enumerate(prm.dilations):
        p = math.ceil(((prm.kernel_size - 1) * d + 1 - prm.stride) / 2)
        ph = p + (extra if hP else 0)
        pw = p + (extra if wP else 0)
        y = jax.lax.conv_general_dilated(
            x_nchw, prm.weights[n],
            window_strides=(prm.stride, prm.stride),
            padding=((ph, ph), (pw, pw)),
            rhs_dilation=(d, d),
            dimension_numbers=("NCHW", "OIHW", "NCHW"))
        y = y + prm.biases[n][None, :, None, None]
        y = 0.5 * y * (1.0 + jax.lax.erf(y / jnp.sqrt(2.0)))
        outs.append(y)
    ys = jnp.stack(outs, axis=-1)                         # (B, E, Ho, Wo, N)
    B_, C_, Ho, Wo, N_ = ys.shape
    y = jnp.transpose(ys, (0, 4, 1, 2, 3)).reshape(B_, N_ * C_, Ho * Wo)
    y = jnp.transpose(y, (0, 2, 1))
    return y, (Ho, Wo)


if __name__ == "__main__":
    key = jax.random.PRNGKey(0)
    k_x, k_p = jax.random.split(key)

    # small shapes consistent with the module: B=2, in_chans=4, 16x16 image,
    # kernel 4, stride/downsample 4, dilations [1, 6, 12], embed_dim=32
    B, C, H, W = 2, 4, 16, 16
    x = jax.random.normal(k_x, (B, C, H, W), dtype=jnp.float32)

    prm = PRM(img_size=H, kernel_size=4, downsample_ratio=4,
              dilations=(1, 6, 12), in_chans=C, embed_dim=32, key=k_p)

    fwd = jax.jit(prm.__call__)
    y, hw = fwd(x)
    y = jax.block_until_ready(y)
    Ho, Wo = int(hw[0]), int(hw[1])

    # verify against pure-JAX reference of the PyTorch forward
    y_ref, (Ho_r, Wo_r) = _reference(prm, x)
    y_ref = jax.block_until_ready(y_ref)
    assert (Ho, Wo) == (Ho_r, Wo_r), ((Ho, Wo), (Ho_r, Wo_r))
    assert y.shape == (B, Ho * Wo, 3 * 32), y.shape
    assert jnp.allclose(y, y_ref, atol=1e-5, rtol=1e-5), float(jnp.abs(y - y_ref).max())

    print("KERNEL_OK")
</pallas_src>

<mosaic_0001>
module attributes {stable_mosaic.version = 11 : i64} {
  func.func @_fused_kernel(%arg0: i32, %arg1: memref<32x192xf32, #tpu.memory_space<vmem>>, %arg2: memref<192x96xf32, #tpu.memory_space<vmem>>, %arg3: memref<1x96xf32, #tpu.memory_space<vmem>>, %arg4: memref<32x96xf32, #tpu.memory_space<vmem>>) attributes {dimension_semantics = [#tpu.dimension_semantics<parallel>], iteration_bounds = array<i64: 1>, scalar_prefetch = 0 : i64, scratch_operands = 0 : i64, tpu.core_type = #tpu.core_type<tc>, window_params = [{transform_indices = @transform_0, window_bounds = array<i64: 32, 192>}, {pipeline_mode = #tpu.pipeline_mode<synchronous>, transform_indices = @transform_1, window_bounds = array<i64: 192, 96>}, {pipeline_mode = #tpu.pipeline_mode<synchronous>, transform_indices = @transform_2, window_bounds = array<i64: 1, 96>}, {transform_indices = @transform_3, window_bounds = array<i64: 32, 96>}]} {
    %c0 = arith.constant 0 : index
    %c0_0 = arith.constant 0 : index
    %0 = vector.load %arg1[%c0, %c0_0] : memref<32x192xf32, #tpu.memory_space<vmem>>, vector<32x192xf32>
    %c0_1 = arith.constant 0 : index
    %c0_2 = arith.constant 0 : index
    %1 = vector.load %arg2[%c0_1, %c0_2] : memref<192x96xf32, #tpu.memory_space<vmem>>, vector<192x96xf32>
    %cst = arith.constant dense<0.000000e+00> : vector<32x96xf32>
    %2 = tpu.matmul %0, %1, %cst {dimension_numbers = #tpu.dot_dimension_numbers<[1], [0], [0], [1], [0, 0, 1, 1], [], []>} : vector<32x192xf32>, vector<192x96xf32>, vector<32x96xf32> -> vector<32x96xf32>
    %c0_3 = arith.constant 0 : index
    %c0_4 = arith.constant 0 : index
    %3 = vector.load %arg3[%c0_3, %c0_4] : memref<1x96xf32, #tpu.memory_space<vmem>>, vector<1x96xf32>
    %4 = vector.broadcast %3 : vector<1x96xf32> to vector<32x96xf32>
    %5 = arith.addf %2, %4 : vector<32x96xf32>
    %cst_5 = arith.constant 5.000000e-01 : f32
    %6 = vector.broadcast %cst_5 : f32 to vector<32x96xf32>
    %7 = arith.mulf %6, %5 : vector<32x96xf32>
    %cst_6 = arith.constant 0.707106769 : f32
    %8 = vector.broadcast %cst_6 : f32 to vector<32x96xf32>
    %9 = arith.mulf %5, %8 : vector<32x96xf32>
    %10 = math.erf %9 : vector<32x96xf32>
    %cst_7 = arith.constant 1.000000e+00 : f32
    %11 = vector.broadcast %cst_7 : f32 to vector<32x96xf32>
    %12 = arith.addf %11, %10 : vector<32x96xf32>
    %13 = arith.mulf %7, %12 : vector<32x96xf32>
    %c0_8 = arith.constant 0 : index
    %c0_9 = arith.constant 0 : index
    %14 = vector.load %arg4[%c0_8, %c0_9] : memref<32x96xf32, #tpu.memory_space<vmem>>, vector<32x96xf32>
    tpu.vector_store %arg4[%c0_8, %c0_9], %13 {strides = array<i32>} : memref<32x96xf32, #tpu.memory_space<vmem>>, vector<32x96xf32>,
    return
  }
  func.func @transform_0(%arg0: i32) -> (i32, i32) {
    %c0_i32 = arith.constant 0 : i32
    %c0_i32_0 = arith.constant 0 : i32
    return %arg0, %c0_i32 : i32, i32
  }
  func.func @transform_1(%arg0: i32) -> (i32, i32) {
    %c0_i32 = arith.constant 0 : i32
    %c0_i32_0 = arith.constant 0 : i32
    %c0_i32_1 = arith.constant 0 : i32
    return %c0_i32, %c0_i32_0 : i32, i32
  }
  func.func @transform_2(%arg0: i32) -> (i32, i32) {
    %c0_i32 = arith.constant 0 : i32
    %c0_i32_0 = arith.constant 0 : i32
    %c0_i32_1 = arith.constant 0 : i32
    return %c0_i32, %c0_i32_0 : i32, i32
  }
  func.func @transform_3(%arg0: i32) -> (i32, i32) {
    %c0_i32 = arith.constant 0 : i32
    %c0_i32_0 = arith.constant 0 : i32
    return %arg0, %c0_i32 : i32, i32
  }
}

</mosaic_0001>

<bundles_post_ra>
// kernel: a_call__.1
= control target key start
LH: loop header
LB: loop body
LE: loop exit
PB: predicated region body
PF: predicated region fallthrough
CT: control target
= control target key end

     0   :  { %s623_s0 = inlined_call_operand.vmem [shape: f32[32,192], index: 0, kind: input, shape index: {}]   ;;  %s624_s1 = inlined_call_operand.vmem [shape: f32[192,96], index: 1, kind: input, shape index: {}]   ;;  %s625_s2 = inlined_call_operand.vmem [shape: f32[1,96], index: 2, kind: input, shape index: {}]   ;;  %s626_s3 = inlined_call_operand.hbm [shape: f32[32,96], index: 3, kind: output, shape index: {}]  }
   0x1   :  { %v38_v0 = vld [vmem:[%s624_s1 + $0x78] sm:$0xff]  ;;  %v37_v1 = vld [vmem:[%s624_s1 + $0x70] sm:$0xff]  ;;  %v36_v3 = vld [vmem:[%s624_s1 + $0x68] sm:$0xff] }
   0x2   :  { %64 = vmatpush.msra.mxu0 %v38_v0  ;;  %329 = vmatpush.msra.mxu2 %v38_v0  ;;  %v46_v2 = vld [vmem:[%s624_s1 + $0xb8] sm:$0xff]  ;;  %v45_v4 = vld [vmem:[%s624_s1 + $0xb0] sm:$0xff]  ;;  %v44_v5 = vld [vmem:[%s624_s1 + $0xa8] sm:$0xff] }
   0x3   :  { %330 = vmatpush.msra.mxu3 %v38_v0  ;;  %101 = vmatpush.msra.mxu1 %v46_v2  ;;  %v35_v6 = vld [vmem:[%s624_s1 + $0x60] sm:$0xff]  ;;  %v34_v8 = vld [vmem:[%s624_s1 + $0x58] sm:$0xff]  ;;  %v33_v10 = vld [vmem:[%s624_s1 + $0x50] sm:$0xff] }
   0x4   :  { %65 = vmatpush.msra.mxu0 %v37_v1  ;;  %331 = vmatpush.msra.mxu2 %v37_v1  ;;  %v43_v7 = vld [vmem:[%s624_s1 + $0xa0] sm:$0xff]  ;;  %v42_v9 = vld [vmem:[%s624_s1 + $0x98] sm:$0xff]  ;;  %v41_v11 = vld [vmem:[%s624_s1 + $0x90] sm:$0xff] }
   0x5   :  { %332 = vmatpush.msra.mxu3 %v37_v1  ;;  %102 = vmatpush.msra.mxu1 %v45_v4  ;;  %v32_v12 = vld [vmem:[%s624_s1 + $0x48] sm:$0xff] }
   0x6   :  { %66 = vmatpush.msra.mxu0 %v36_v3  ;;  %333 = vmatpush.msra.mxu2 %v36_v3  ;;  %v40_v13 = vld [vmem:[%s624_s1 + $0x88] sm:$0xff] }
   0x7   :  { %334 = vmatpush.msra.mxu3 %v36_v3  ;;  %103 = vmatpush.msra.mxu1 %v44_v5 }
   0x8   :  { %67 = vmatpush.msra.mxu0 %v35_v6  ;;  %335 = vmatpush.msra.mxu2 %v35_v6 }
   0x9   :  { %336 = vmatpush.msra.mxu3 %v35_v6  ;;  %104 = vmatpush.msra.mxu1 %v43_v7 }
   0xa   :  { %68 = vmatpush.msra.mxu0 %v34_v8  ;;  %337 = vmatpush.msra.mxu2 %v34_v8 }
   0xb   :  { %338 = vmatpush.msra.mxu3 %v34_v8  ;;  %105 = vmatpush.msra.mxu1 %v42_v9 }
   0xc   :  { %69 = vmatpush.msra.mxu0 %v33_v10  ;;  %339 = vmatpush.msra.mxu2 %v33_v10 }
   0xd   :  { %8 = vsyncpa [#allocation3], 0  ;;  %340 = vmatpush.msra.mxu3 %v33_v10  ;;  %v31_v14 = vld [vmem:[%s624_s1 + $0x40] sm:$0xff]  ;;  %106 = vmatpush.msra.mxu1 %v41_v11  ;;  %v30_v16 = vld [vmem:[%s624_s1 + $0x38] sm:$0xff]  ;;  %vm51_vm0 = vcmask 523264   ;;  %vm298_vm5 = vcmask 785408  }
   0xe   :  { %70 = vmatpush.msra.mxu0 %v32_v12  ;;  %341 = vmatpush.msra.mxu2 %v32_v12  ;;  %v39_v15 = vld [vmem:[%s624_s1 + $0x80] sm:$0xff]  ;;  %v16_v17 = vld [vmem:[%s623_s0 + $0x8] sm:$0xff]  ;;  %v29_v18 = vld [vmem:[%s624_s1 + $0x30] sm:$0xff]  ;;  %s309_s25 = sshll.u32 %s626_s3, 4  ;;  %s400_s26 = smov 128   ;;  %s310_s25 = int_to_ptr.hbm [resolvable:$true] %s309_s25 }
   0xf   :  { %342 = vmatpush.msra.mxu3 %v32_v12  ;;  %107 = vmatpush.msra.mxu1 %v40_v13  ;;  %v28_v19 = vld [vmem:[%s624_s1 + $0x28] sm:$0xff]  ;;  %v27_v20 = vld [vmem:[%s624_s1 + $0x20] sm:$0xff]  ;;  %v26_v21 = vld [vmem:[%s624_s1 + $0x18] sm:$0xff]  ;;  %s401_s27 = smov 8  }
  0x10   :  { %71 = vmatpush.msra.mxu0 %v31_v14  ;;  %343 = vmatpush.msra.mxu2 %v31_v14  ;;  %v18_v22 = vld [vmem:[%s623_s0 + $0x18] sm:$0xff]  ;;  %v25_v23 = vld [vmem:[%s624_s1 + $0x10] sm:$0xff]  ;;  %v24_v24 = vld [vmem:[%s624_s1 + $0x8] sm:$0xff] }
  0x11   :  { %344 = vmatpush.msra.mxu3 %v31_v14  ;;  %108 = vmatpush.msra.mxu1 %v39_v15  ;;  %v23_v25 = vld [vmem:[%s624_s1] sm:$0xff]  ;;  %v17_v27 = vld [vmem:[%s623_s0 + $0x10] sm:$0xff]  ;;  %v20_v29 = vld [vmem:[%s623_s0 + $0x28] sm:$0xff] }
  0x12   :  { %72 = vmatpush.msra.mxu0 %v30_v16  ;;  %345 = vmatpush.msra.mxu2 %v30_v16  ;;  %v15_v26 = vld [vmem:[%s623_s0] sm:$0xff]  ;;  %v21_v30 = vld [vmem:[%s623_s0 + $0x30] sm:$0xff]  ;;  %v22_v31 = vld [vmem:[%s623_s0 + $0x38] sm:$0xff] }
  0x13   :  { %346 = vmatpush.msra.mxu3 %v30_v16  ;;  %321 = vmatmul.msk.f32.vlgmr.msra.gmra.mxu1 %vm51_vm0, %v16_v17  ;;  %v19_v28 = vld [vmem:[%s623_s0 + $0x20] sm:$0xff]  ;;  %s399_s0 = smov [#allocation2]  }
  0x14   :  { %73 = vmatpush.msra.mxu0 %v29_v18  ;;  %347 = vmatpush.msra.mxu2 %v29_v18  ;;  %v364_v34 = vld [vmem:[%s625_s2] ss:$0 sm:$0xff]  ;;  %s307_s2 = sshll.u32 %s399_s0, 4  ;;  %s308_s2 = int_to_ptr.vmem [resolvable:$true] %s307_s2 }
  0x15   :  { %348 = vmatpush.msra.mxu3 %v29_v18 }
  0x16   :  { %74 = vmatpush.msra.mxu0 %v28_v19  ;;  %349 = vmatpush.msra.mxu2 %v28_v19 }
  0x17   :  { %350 = vmatpush.msra.mxu3 %v28_v19 }
  0x18   :  { %75 = vmatpush.msra.mxu0 %v27_v20  ;;  %351 = vmatpush.msra.mxu2 %v27_v20 }
  0x19   :  { %352 = vmatpush.msra.mxu3 %v27_v20 }
  0x1a   :  { %76 = vmatpush.msra.mxu0 %v26_v21  ;;  %353 = vmatpush.msra.mxu2 %v26_v21 }
  0x1b   :  { %354 = vmatpush.msra.mxu3 %v26_v21  ;;  %322 = vmatmul.msk.f32.gmra.mxu1 %vm51_vm0, %v18_v22 }
  0x1c   :  { %77 = vmatpush.msra.mxu0 %v25_v23  ;;  %355 = vmatpush.msra.mxu2 %v25_v23 }
  0x1d   :  { %356 = vmatpush.msra.mxu3 %v25_v23 }
  0x1e   :  { %78 = vmatpush.msra.mxu0 %v24_v24  ;;  %357 = vmatpush.msra.mxu2 %v24_v24 }
  0x1f   :  { %358 = vmatpush.msra.mxu3 %v24_v24 }
  0x20   :  { %79 = vmatpush.msra.mxu0 %v23_v25  ;;  %359 = vmatpush.msra.mxu2 %v23_v25 }
  0x21   :  { %360 = vmatpush.msra.mxu3 %v23_v25  ;;  %80 = vmatmul.f32.vlgmr.msra.gmra.mxu0 %v15_v26 }
  0x22   :  { %83 = vmatmul.f32.vlgmr.msra.gmra.mxu2 %v17_v27  ;;  %86 = vmatmul.f32.vlgmr.msra.gmra.mxu3 %v19_v28 }
  0x23   :  { %323 = vmatmul.msk.f32.gmra.mxu1 %vm51_vm0, %v20_v29 }
  0x2a   :  { %89 = vmatmul.f32.gmra.mxu3 %v21_v30 }
  0x2b   :  { %324 = vmatmul.msk.f32.gmra.mxu1 %vm51_vm0, %v22_v31 }
  0x90   :  { %v110_v32 = vpop.f32.mrf.mxu1 }
  0x98   :  { %v113_v33 = vpop.f32.mrf.mxu1 }
  0x9e   :  { %v81_v35 = vpop.f32.mrf.mxu0 }
  0x9f   :  { %v82_v36 = vadd.f32 %v364_v34, %v81_v35 }
  0xa0   :  { %v116_v39 = vpop.f32.mrf.mxu1 }
  0xa1   :  { %v525_v37 = vadd.f32 %v110_v32, %v82_v36 }
  0xa3   :  { %v528_v38 = vmul.f32 0.70710677, %v525_v37 }
  0xa5   :  { %v130_v40 = vmul.f32 %v528_v38, %v528_v38  ;;  %v84_v41 = vpop.f32.mrf.mxu2  ;;  %v87_v42 = vpop.f32.mrf.mxu3 }
  0xa6   :  { %v85_v43 = vadd.f32 %v364_v34, %v84_v41  ;;  %v88_v44 = vadd.f32 %v364_v34, %v87_v42 }
  0xa7   :  { %v532_v45 = vmin.f32 %v130_v40, 16.0 }
  0xa8   :  { %v534_v46 = vadd.f32 %v113_v33, %v85_v43  ;;  %v536_v47 = vadd.f32 %v116_v39, %v88_v44  ;;  %v119_v5 = vpop.f32.mrf.mxu1 }
  0xa9   :  { %v132_v48 = vmul.f32 2.1237322e-06, %v532_v45  ;;  %v143_v49 = vmul.f32 3.8918573e-05, %v532_v45 }
  0xaa   :  { %v541_v50 = vmul.f32 0.70710677, %v534_v46  ;;  %v544_v51 = vmul.f32 0.70710677, %v536_v47 }
  0xab   :  { %v133_v52 = vadd.f32 0.00028619796, %v132_v48  ;;  %v144_v53 = vadd.f32 0.001143296, %v143_v49 }
  0xac   :  { %v170_v54 = vmul.f32 %v541_v50, %v541_v50  ;;  %v210_v55 = vmul.f32 %v544_v51, %v544_v51 }
  0xad   :  { %v134_v56 = vmul.f32 %v133_v52, %v532_v45  ;;  %v145_v57 = vmul.f32 %v144_v53, %v532_v45  ;;  %v90_v58 = vpop.f32.mrf.mxu3 }
  0xae   :  { %v552_v59 = vmin.f32 %v170_v54, 16.0  ;;  %v554_v60 = vmin.f32 %v210_v55, 16.0  ;;  %v91_v2 = vadd.f32 %v364_v34, %v90_v58 }
  0xaf   :  { %v135_v61 = vadd.f32 0.0036580483, %v134_v56  ;;  %v146_v62 = vadd.f32 0.014752088, %v145_v57 }
  0xb0   :  { %v172_v63 = vmul.f32 2.1237322e-06, %v552_v59  ;;  %v183_v0 = vmul.f32 3.8918573e-05, %v552_v59  ;;  %v212_v1 = vmul.f32 2.1237322e-06, %v554_v60  ;;  %v565_v15 = vadd.f32 %v119_v5, %v91_v2 }
  0xb1   :  { %v147_v3 = vmul.f32 %v146_v62, %v532_v45  ;;  %v223_v4 = vmul.f32 3.8918573e-05, %v554_v60  ;;  %v136_v9 = vmul.f32 %v135_v61, %v532_v45 }
  0xb2   :  { %v173_v6 = vadd.f32 0.00028619796, %v172_v63  ;;  %v184_v7 = vadd.f32 0.001143296, %v183_v0  ;;  %v213_v8 = vadd.f32 0.00028619796, %v212_v1 }
  0xb3   :  { %v148_v10 = vadd.f32 0.112945676, %v147_v3  ;;  %v224_v11 = vadd.f32 0.001143296, %v223_v4  ;;  %v137_v21 = vadd.f32 0.05243302, %v136_v9 }
  0xb4   :  { %v174_v12 = vmul.f32 %v173_v6, %v552_v59  ;;  %v185_v13 = vmul.f32 %v184_v7, %v552_v59  ;;  %v214_v14 = vmul.f32 %v213_v8, %v554_v60  ;;  %v572_v26 = vmul.f32 0.70710677, %v565_v15 }
  0xb5   :  { %v149_v16 = vmul.f32 %v148_v10, %v532_v45  ;;  %v225_v17 = vmul.f32 %v224_v11, %v554_v60  ;;  %v138_v32 = vmul.f32 %v137_v21, %v532_v45 }
  0xb6   :  { %v175_v18 = vadd.f32 0.0036580483, %v174_v12  ;;  %v186_v19 = vadd.f32 0.014752088, %v185_v13  ;;  %v215_v20 = vadd.f32 0.0036580483, %v214_v14  ;;  %v250_v31 = vmul.f32 %v572_v26, %v572_v26 }
  0xb7   :  { %v150_v22 = vadd.f32 0.4994258, %v149_v16  ;;  %v226_v23 = vadd.f32 0.014752088, %v225_v17  ;;  %v139_v43 = vadd.f32 0.18741608, %v138_v32 }
  0xb8   :  { %v176_v24 = vmul.f32 %v175_v18, %v552_v59  ;;  %v187_v25 = vmul.f32 %v186_v19, %v552_v59  ;;  %v216_v30 = vmul.f32 %v215_v20, %v554_v60  ;;  %v581_v39 = vmin.f32 %v250_v31, 16.0 }
  0xb9   :  { %v151_v27 = vmul.f32 %v150_v22, %v532_v45  ;;  %v227_v28 = vmul.f32 %v226_v23, %v554_v60  ;;  %v140_v58 = vmul.f32 %v139_v43, %v532_v45  ;;  %v122_v12 = vmul.f32 0.5, %v525_v37 }
  0xba   :  { %v188_v29 = vadd.f32 0.112945676, %v187_v25  ;;  %v177_v35 = vadd.f32 0.05243302, %v176_v24  ;;  %v217_v41 = vadd.f32 0.05243302, %v216_v30 }
  0xbb   :  { %v152_v33 = vadd.f32 1.0, %v151_v27  ;;  %v228_v34 = vadd.f32 0.112945676, %v227_v28  ;;  %v252_v44 = vmul.f32 2.1237322e-06, %v581_v39 }
  0xbc   :  { %v189_v36 = vmul.f32 %v188_v29, %v552_v59  ;;  %v178_v48 = vmul.f32 %v177_v35, %v552_v59  ;;  %v263_v53 = vmul.f32 3.8918573e-05, %v581_v39  ;;  %v218_v55 = vmul.f32 %v217_v41, %v554_v60 }
  0xbd   :  { %365 = vrcp.f32 %v152_v33  ;;  %v229_v42 = vmul.f32 %v228_v34, %v554_v60  ;;  %v253_v61 = vadd.f32 0.00028619796, %v252_v44  ;;  %v141_v5 = vadd.f32 1.1283791, %v140_v58 }
  0xbe   :  { %v190_v40 = vadd.f32 0.4994258, %v189_v36  ;;  %v264_v62 = vadd.f32 0.001143296, %v263_v53  ;;  %v179_v0 = vadd.f32 0.18741608, %v178_v48  ;;  %vm158_vm2 = vweird.f32 %v152_v33 }
  0xbf   :  { %v230_v52 = vadd.f32 0.4994258, %v229_v42  ;;  %v219_v2 = vadd.f32 0.18741608, %v218_v55  ;;  %v162_v6 = vand.u32 2147483647, %v152_v33  ;;  %v254_v8 = vmul.f32 %v253_v61, %v581_v39 }
  0xc0   :  { %v191_v49 = vmul.f32 %v190_v40, %v552_v59  ;;  %v265_v4 = vmul.f32 %v264_v62, %v581_v39  ;;  %v164_v7 = vand.u32 2147483648, %v152_v33  ;;  %v180_v45 = vmul.f32 %v179_v0, %v552_v59 }
  0xc1   :  { %v231_v56 = vmul.f32 %v230_v52, %v554_v60  ;;  %v220_v14 = vmul.f32 %v219_v2, %v554_v60  ;;  %v142_v16 = vmul.f32 %v141_v5, %v528_v38  ;;  %v255_v19 = vadd.f32 0.0036580483, %v254_v8 }
  0xc2   :  { %v192_v54 = vadd.f32 1.0, %v191_v49  ;;  %v266_v10 = vadd.f32 0.014752088, %v265_v4  ;;  %v165_v17 = vor.u32 1.1754944e-38, %v164_v7  ;;  %vm163_vm4 = vcmp.eq.f32.partialorder %v162_v6, 8.507059e+37 }
  0xc3   :  { %v366_v57 = vpop.eup %365  ;;  %v591_v3 = vadd.f32 1.0, %v231_v56  ;;  %v181_v21 = vadd.f32 1.1283791, %v180_v45  ;;  %v221_v28 = vadd.f32 1.1283791, %v220_v14  ;;  %v256_v30 = vmul.f32 %v255_v19, %v581_v39 }
  0xc4   :  { %v154_v63 = vmul.f32 %v366_v57, %v152_v33  ;;  %367 = vrcp.f32 %v192_v54  ;;  %vm159_vm1 = vweird.f32 %v366_v57  ;;  %v267_v59 = vmul.f32 %v266_v10, %v581_v39 }
  0xc5   :  { %369 = vrcp.f32 %v591_v3  ;;  %vm160_vm3 = vmor %vm158_vm2, %vm159_vm1  ;;  %v202_v24 = vand.u32 2147483647, %v192_v54  ;;  %v204_v25 = vand.u32 2147483648, %v192_v54  ;;  %v182_v32 = vmul.f32 %v181_v21, %v541_v50 }
  0xc6   :  { %v155_v1 = vsub.f32 1.0, %v154_v63  ;;  %v268_v60 = vadd.f32 0.112945676, %v267_v59  ;;  %vm198_vm7 = vweird.f32 %v192_v54  ;;  %v242_v41 = vand.u32 2147483647, %v591_v3 }
  0xc7   :  { %vm203_vm8 = vcmp.eq.f32.partialorder %v202_v24, 8.507059e+37  ;;  %v205_v35 = vor.u32 1.1754944e-38, %v204_v25  ;;  %v244_v42 = vand.u32 2147483648, %v591_v3  ;;  %v257_v49 = vadd.f32 0.05243302, %v256_v30 }
  0xc8   :  { %v156_v9 = vmul.f32 %v366_v57, %v155_v1  ;;  %v269_v33 = vmul.f32 %v268_v60, %v581_v39  ;;  %vm238_vm11 = vweird.f32 %v591_v3  ;;  %v222_v56 = vmul.f32 %v221_v28, %v544_v51 }
  0xc9   :  { %vm243_vm13 = vcmp.eq.f32.partialorder %v242_v41, 8.507059e+37  ;;  %v258_v63 = vmul.f32 %v257_v49, %v581_v39  ;;  %v123_v1 = vmul.f32 0.5, %v534_v46  ;;  %v124_v51 = vmul.f32 0.5, %v536_v47 }
  0xca   :  { %v368_v11 = vpop.eup %367  ;;  %v157_v13 = vadd.f32 %v366_v57, %v156_v9  ;;  %v270_v43 = vadd.f32 0.4994258, %v269_v33  ;;  %v125_v21 = vmul.f32 0.5, %v565_v15 }
  0xcb   :  { %v194_v18 = vmul.f32 %v368_v11, %v192_v54  ;;  %v370_v37 = vpop.eup %369  ;;  %vm199_vm6 = vweird.f32 %v368_v11  ;;  %v259_v6 = vadd.f32 0.18741608, %v258_v63 }
  0xcc   :  { %v161_v20 = vsel %vm160_vm3, %v366_v57, %v157_v13  ;;  %v234_v38 = vmul.f32 %v370_v37, %v591_v3  ;;  %vm200_vm9 = vmor %vm198_vm7, %vm199_vm6  ;;  %vm239_vm10 = vweird.f32 %v370_v37  ;;  %v271_v53 = vmul.f32 %v270_v43, %v581_v39 }
  0xcd   :  { %v166_v22 = vsel %vm163_vm4, %v165_v17, %v161_v20  ;;  %v195_v23 = vsub.f32 1.0, %v194_v18  ;;  %vm240_vm12 = vmor %vm238_vm11, %vm239_vm10  ;;  %v245_v57 = vor.u32 1.1754944e-38, %v244_v42  ;;  %v260_v45 = vmul.f32 %v259_v6, %v581_v39 }
  0xce   :  { %v167_v27 = vmul.f32 %v166_v22, %v142_v16  ;;  %v235_v36 = vsub.f32 1.0, %v234_v38  ;;  %v272_v58 = vadd.f32 1.0, %v271_v53 }
  0xcf   :  { %v196_v29 = vmul.f32 %v368_v11, %v195_v23  ;;  %v261_v46 = vadd.f32 1.1283791, %v260_v45 }
  0xd0   :  { %v325_v31 = vclamps-f32 %v167_v27, 1.0  ;;  %v236_v48 = vmul.f32 %v370_v37, %v235_v36  ;;  %371 = vrcp.f32 %v272_v58  ;;  %v282_v14 = vand.u32 2147483647, %v272_v58 }
  0xd1   :  { %v197_v34 = vadd.f32 %v368_v11, %v196_v29  ;;  %vm278_vm15 = vweird.f32 %v272_v58  ;;  %v262_v47 = vmul.f32 %v261_v46, %v572_v26 }
  0xd2   :  { %v290_v40 = vadd.f32 1.0, %v325_v31  ;;  %v237_v55 = vadd.f32 %v370_v37, %v236_v48  ;;  %vm283_vm1 = vcmp.eq.f32.partialorder %v282_v14, 8.507059e+37 }
  0xd3   :  { %v201_v44 = vsel %vm200_vm9, %v368_v11, %v197_v34 }
  0xd4   :  { %v294_v52 = vmul.f32 %v290_v40, %v122_v12  ;;  %v206_v50 = vsel %vm203_vm8, %v205_v35, %v201_v44  ;;  %v241_v62 = vsel %vm240_vm12, %v370_v37, %v237_v55  ;;  %v284_v12 = vand.u32 2147483648, %v272_v58 }
  0xd5   :  { %v207_v54 = vmul.f32 %v206_v50, %v182_v32  ;;  %v246_v0 = vsel %vm243_vm13, %v245_v57, %v241_v62 }
  0xd6   :  { %299 = vst.msk [vmem:[#allocation2] sm:$0xff] %vm298_vm5, %v294_v52  ;;  %v247_v4 = vmul.f32 %v246_v0, %v222_v56  ;;  %v372_v8 = vpop.eup %371  ;;  %v285_v17 = vor.u32 1.1754944e-38, %v284_v12 }
  0xd7   :  { %v326_v61 = vclamps-f32 %v207_v54, 1.0  ;;  %v274_v10 = vmul.f32 %v372_v8, %v272_v58  ;;  %vm279_vm14 = vweird.f32 %v372_v8 }
  0xd8   :  { %v327_v3 = vclamps-f32 %v247_v4, 1.0  ;;  %vm280_vm0 = vmor %vm278_vm15, %vm279_vm14 }
  0xd9   :  { %v291_v2 = vadd.f32 1.0, %v326_v61  ;;  %v275_v11 = vsub.f32 1.0, %v274_v10 }
  0xda   :  { %v292_v7 = vadd.f32 1.0, %v327_v3 }
  0xdb   :  { %v295_v5 = vmul.f32 %v291_v2, %v123_v1  ;;  %v276_v13 = vmul.f32 %v372_v8, %v275_v11 }
  0xdc   :  { %v296_v9 = vmul.f32 %v292_v7, %v124_v51 }
  0xdd   :  { %300 = vst.msk [vmem:[#allocation2 + $0x8] sm:$0xff] %vm298_vm5, %v295_v5  ;;  %v277_v16 = vadd.f32 %v372_v8, %v276_v13 }
  0xde   :  { %301 = vst.msk [vmem:[#allocation2 + $0x10] sm:$0xff] %vm298_vm5, %v296_v9 }
  0xdf   :  { %v281_v18 = vsel %vm280_vm0, %v372_v8, %v277_v16 }
  0xe0   :  { %v286_v19 = vsel %vm283_vm1, %v285_v17, %v281_v18 }
  0xe1   :  { %v287_v20 = vmul.f32 %v286_v19, %v262_v47 }
  0xe3   :  { %v328_v39 = vclamps-f32 %v287_v20, 1.0 }
  0xe5   :  { %v293_v59 = vadd.f32 1.0, %v328_v39 }
  0xe7   :  { %v297_v22 = vmul.f32 %v293_v59, %v125_v21 }
  0xe9   :  { %302 = vst.msk [vmem:[#allocation2 + $0x18] sm:$0xff] %vm298_vm5, %v297_v22 }
  0xea   :  { %315 = dma.vmem_to_hbm [thread:$0]  %s308_s2, 512, %s310_s25, [#allocation3], %s400_s26, %s400_s26, %s401_s27  }
  0xeb   :  { %397 = dma.done.wait [#allocation3], 512  }
  0xec   :  { %398 = vsyncadd [#allocation3], 4294966784 }
  0xed   :  { %320 = vsyncpa [#allocation3], 1 }

</bundles_post_ra>
